<compile_context>
chip_gen: v7x
topology: tpu7x:2x2x1
jax: 0.10.0
libtpu: 0.0.40
codegen_flags: <defaults>
</compile_context>

<pallas_src>
import functools

import jax
import jax.numpy as jnp
from jax.experimental import pallas as pl
from jax.experimental.pallas import tpu as pltpu

_LANE = 128


def _vmem_physical_bytes():
    """Physical VMEM per TensorCore (64 MiB on v7x, 128 MiB on v5e/v6e)."""
    try:
        info = pltpu.get_tpu_info()
        v = getattr(info, "vmem_capacity_bytes", None)
        if v:
            return int(v)
    except Exception:
        pass
    return 64 << 20  # conservative default (v7x)


def _channel_attention_kernel(
    x_ref, w1_ref, w2_ref, out_ref, sum_acc, max_acc,
    *, hw_total, hw_tile, acc_w, needs_mask,
):
    """Grid = (B, HW_tiles); HW (reduction) axis is last / 'arbitrary'.

    x_ref:   (1, C, hw_tile)   native-dtype spatial tile of one batch row
    w1_ref:  (C, hidden)       transposed weight of the squeeze 1x1 conv
    w2_ref:  (hidden, C)       transposed weight of the excite 1x1 conv
    out_ref: (1, 1, C)         sigmoid(MLP(avg) + MLP(max)) for this batch row
    sum_acc, max_acc: (1, C, acc_w) f32 lane-resident running accumulators
    """
    h = pl.program_id(1)
    nh = pl.num_programs(1)
    C = x_ref.shape[1]
    n_chunks = hw_tile // acc_w

    # --- init running accumulators on the first spatial tile -----------------
    @pl.when(h == 0)
    def _():
        sum_acc[...] = jnp.zeros_like(sum_acc)
        max_acc[...] = jnp.full_like(max_acc, -jnp.inf)

    def tile_reduce(masked):
        # Register-resident per-tile partials: the scratch accumulators are
        # read-modified-written exactly ONCE per grid step, not per chunk.
        if masked:
            lane_idx = jax.lax.broadcasted_iota(jnp.int32, (1, 1, acc_w), 2)
            tile_base = h * hw_tile

        def chunk_partial(start, ls, lm):
            chunk = x_ref[:, :, pl.ds(start, acc_w)].astype(jnp.float32)
            if masked:
                valid = (tile_base + start + lane_idx) < hw_total
                ls = ls + jnp.where(valid, chunk, 0.0)
                lm = jnp.maximum(lm, jnp.where(valid, chunk, -jnp.inf))
            else:
                ls = ls + chunk
                lm = jnp.maximum(lm, chunk)
            return ls, lm

        init_s = jnp.zeros((1, C, acc_w), jnp.float32)
        init_m = jnp.full((1, C, acc_w), -jnp.inf, jnp.float32)
        if n_chunks <= 8:
            # Short, fully unrolled chunk loop (small tiles).
            ls, lm = init_s, init_m
            for j in range(n_chunks):
                ls, lm = chunk_partial(j * acc_w, ls, lm)
        else:
            # Bounded code size for multi-MiB tiles: moderately unrolled loop.
            # TODO(synk): for very large C (>~256 in f32) flush the register
            # partials to scratch every few chunks to avoid vreg spills.
            def body(j, carry):
                ls, lm = carry
                start = pl.multiple_of(j * acc_w, acc_w)
                return chunk_partial(start, ls, lm)

            ls, lm = jax.lax.fori_loop(
                0, n_chunks, body, (init_s, init_m), unroll=4)

        sum_acc[...] += ls
        # TODO(synk): on v6e/v7x a bf16 max accumulator (max is exact in bf16)
        # would halve the VALU/vst pressure here; kept f32 for v5e safety.
        max_acc[...] = jnp.maximum(max_acc[...], lm)

    if needs_mask:
        # Masking (compare + selects) only runs on the final, ragged tile.
        @pl.when(h < nh - 1)
        def _():
            tile_reduce(masked=False)

        @pl.when(h == nh - 1)
        def _():
            tile_reduce(masked=True)
    else:
        tile_reduce(masked=False)

    # --- finalize: one XLU reduce + fused tiny MLP + sigmoid ------------------
    @pl.when(h == nh - 1)
    def _():
        avg_p = jnp.sum(sum_acc[...], axis=-1) * (1.0 / float(hw_total))  # (1, C)
        max_p = jnp.max(max_acc[...], axis=-1)                            # (1, C)

        # Fuse the two shared-MLP applications into a single pair of matmuls.
        p = jnp.concatenate([avg_p, max_p], axis=0)                       # (2, C)
        w1 = w1_ref[...].astype(jnp.float32)                              # (C, hid)
        w2 = w2_ref[...].astype(jnp.float32)                              # (hid, C)
        hid = jnp.maximum(
            jnp.dot(p, w1, preferred_element_type=jnp.float32), 0.0)
        o = jnp.dot(hid, w2, preferred_element_type=jnp.float32)          # (2, C)
        out = jax.nn.sigmoid(o[0:1] + o[1:2])                             # (1, C)
        out_ref[...] = out[:, None, :].astype(out_ref.dtype)


def channel_attention(x, w1_conv, w2_conv, *, hw_tile=None, input_buffers=2):
    """CBAM channel attention.

    x:       (B, C, H, W)      NCHW, any float dtype (kept native in HBM)
    w1_conv: (C//r, C, 1, 1)   Conv2d weight of the squeeze 1x1 conv (no bias)
    w2_conv: (C, C//r, 1, 1)   Conv2d weight of the excite 1x1 conv (no bias)
    returns: (B, C, 1, 1) attention map, same dtype as x
    """
    B, C, H, W = x.shape
    hidden = w1_conv.shape[0]
    HW = H * W

    x_flat = x.reshape(B, C, HW)                 # free reshape (NCHW contiguous)
    w1 = w1_conv.reshape(hidden, C).T            # (C, hidden)
    w2 = w2_conv.reshape(C, hidden).T            # (hidden, C)

    itemsize = x.dtype.itemsize
    hw_padded = pl.cdiv(HW, _LANE) * _LANE

    # --- generation-aware budgets --------------------------------------------
    vmem_physical = _vmem_physical_bytes()
    # Never request all of VMEM: leave ~8 MiB headroom for compiler temporaries.
    vmem_cap = max(16 << 20, min(vmem_physical - (8 << 20), 96 << 20))
    # Multi-MiB input tiles: ~8 MiB on 128-MiB parts (v5e/v6e), ~5 MiB on v7x.
    tile_target_bytes = (8 << 20) if vmem_physical >= (96 << 20) else (5 << 20)

    # --- register-accumulation slice width (lanes per chunk) -----------------
    # Keep each local (C, acc_w) f32 partial at <= ~32 KiB (8 vregs).
    acc_w = (32 * 1024) // max(1, 4 * C)
    acc_w = max(_LANE, min(512, (acc_w // _LANE) * _LANE))
    acc_w = min(acc_w, hw_padded)

    # --- spatial tile size: byte-based, no lane cap ---------------------------
    if hw_tile is None:
        hw_tile = max(
            acc_w,
            (tile_target_bytes // max(1, C * itemsize)) // acc_w * acc_w)
    else:
        hw_tile = max(_LANE, (int(hw_tile) // _LANE) * _LANE)
        acc_w = min(acc_w, hw_tile)
        hw_tile = max(acc_w, (hw_tile // acc_w) * acc_w)
    cover = pl.cdiv(HW, acc_w) * acc_w           # lanes needed to cover H*W
    hw_tile = int(min(hw_tile, cover))

    # --- VMEM accounting: shrink the tile rather than over-asking VMEM -------
    nbuf = max(2, int(input_buffers))
    acc_bytes = 2 * C * acc_w * 4
    w_bytes = 2 * (2 * C * hidden * w1.dtype.itemsize)
    fixed_bytes = acc_bytes + w_bytes + 2 * C * 4 + (2 << 20)
    max_tile_bytes = max(C * acc_w * itemsize, (vmem_cap - fixed_bytes) // nbuf)
    max_tile_lanes = max(
        acc_w, (max_tile_bytes // max(1, C * itemsize)) // acc_w * acc_w)
    hw_tile = int(min(hw_tile, max_tile_lanes))

    nh = pl.cdiv(HW, hw_tile)
    needs_mask = (HW % hw_tile) != 0
    grid = (B, nh)
    # TODO(synk): v7x megacore — for B == 1 split the HW range across the two
    # TensorCores (partial (sum, max) outputs + tiny epilogue combine).

    if input_buffers != 2:
        # Deeper pipelining only pays off when VMEM forces small tiles.
        x_spec = pl.BlockSpec((1, C, hw_tile), lambda b, h: (b, 0, h),
                              pipeline_mode=pl.Buffered(input_buffers))
    else:
        x_spec = pl.BlockSpec((1, C, hw_tile), lambda b, h: (b, 0, h))
    w1_spec = pl.BlockSpec((C, hidden), lambda b, h: (0, 0))
    w2_spec = pl.BlockSpec((hidden, C), lambda b, h: (0, 0))
    out_spec = pl.BlockSpec((1, 1, C), lambda b, h: (b, 0, 0))

    vmem_needed = nbuf * C * hw_tile * itemsize + fixed_bytes
    vmem_limit = int(min(max(vmem_needed, 16 << 20), vmem_cap))

    kernel = functools.partial(
        _channel_attention_kernel,
        hw_total=HW, hw_tile=hw_tile, acc_w=acc_w, needs_mask=needs_mask)

    out = pl.pallas_call(
        kernel,
        out_shape=jax.ShapeDtypeStruct((B, 1, C), x.dtype),
        grid_spec=pltpu.PrefetchScalarGridSpec(
            num_scalar_prefetch=0,
            grid=grid,
            in_specs=[x_spec, w1_spec, w2_spec],
            out_specs=out_spec,
            scratch_shapes=[
                pltpu.VMEM((1, C, acc_w), jnp.float32),   # running sum
                pltpu.VMEM((1, C, acc_w), jnp.float32),   # running max
            ],
        ),
        compiler_params=pltpu.CompilerParams(
            dimension_semantics=("parallel", "arbitrary"),
            vmem_limit_bytes=vmem_limit,
        ),
    )(x_flat, w1, w2)

    return out.reshape(B, C, 1, 1)


def channel_attention_ref(x, w1_conv, w2_conv):
    """Pure-JAX reference mirroring the PyTorch forward."""
    B, C, H, W = x.shape
    hidden = w1_conv.shape[0]
    w1 = w1_conv.reshape(hidden, C)
    w2 = w2_conv.reshape(C, hidden)

    def mlp(p):  # p: (B, C)
        h = jnp.maximum(p @ w1.T, 0.0)
        return h @ w2.T

    xf = x.astype(jnp.float32)
    avg_p = jnp.mean(xf, axis=(2, 3))
    max_p = jnp.max(xf, axis=(2, 3))
    out = jax.nn.sigmoid(mlp(avg_p) + mlp(max_p))
    return out.reshape(B, C, 1, 1).astype(x.dtype)


if __name__ == "__main__":
    # Small shapes consistent with the module: in_planes=32, ratio=16 -> hidden=2
    B, C, H, W = 2, 32, 16, 16
    ratio = 16
    hidden = C // ratio

    key = jax.random.PRNGKey(0)
    kx, k1, k2 = jax.random.split(key, 3)

    x = jax.random.normal(kx, (B, C, H, W), dtype=jnp.float32)
    # Deterministic synthetic Conv2d weights (no bias), kaiming-ish scale.
    w1_conv = jax.random.normal(k1, (hidden, C, 1, 1), dtype=jnp.float32) * (2.0 / C) ** 0.5
    w2_conv = jax.random.normal(k2, (C, hidden, 1, 1), dtype=jnp.float32) * (2.0 / hidden) ** 0.5

    # 1) Default auto-tiled path (single full tile).
    out = jax.block_until_ready(channel_attention(x, w1_conv, w2_conv))
    ref = channel_attention_ref(x, w1_conv, w2_conv)
    assert out.shape == (B, C, 1, 1)
    assert jnp.allclose(out, ref, atol=1e-5, rtol=1e-5), "mismatch vs reference"

    # 2) Multi-tile spatial reduction + ragged (masked-last-tile-only) path.
    x2 = jax.random.normal(jax.random.PRNGKey(1), (B, C, 20, 20), dtype=jnp.float32)
    out2 = jax.block_until_ready(
        channel_attention(x2, w1_conv, w2_conv, hw_tile=128))
    ref2 = channel_attention_ref(x2, w1_conv, w2_conv)
    assert out2.shape == (B, C, 1, 1)
    assert jnp.allclose(out2, ref2, atol=1e-5, rtol=1e-5), "mismatch (masked path)"

    # 3) bf16 input, default auto tiling, ragged HW (masked single tile, 2 chunks).
    x3 = jax.random.normal(jax.random.PRNGKey(2), (B, C, 20, 20)).astype(jnp.bfloat16)
    out3 = jax.block_until_ready(channel_attention(x3, w1_conv, w2_conv))
    ref3 = channel_attention_ref(x3, w1_conv, w2_conv)
    assert out3.shape == (B, C, 1, 1)
    assert jnp.allclose(out3.astype(jnp.float32), ref3.astype(jnp.float32),
                        atol=2e-2, rtol=2e-2), "mismatch (bf16 path)"

    print("KERNEL_OK")
</pallas_src>

<mosaic_0001>
module attributes {stable_mosaic.version = 11 : i64} {
  func.func @_channel_attention_kernel(%arg0: i32, %arg1: i32, %arg2: memref<1x32x256xf32, #tpu.memory_space<vmem>>, %arg3: memref<32x2xf32, #tpu.memory_space<vmem>>, %arg4: memref<2x32xf32, #tpu.memory_space<vmem>>, %arg5: memref<1x1x32xf32, #tpu.memory_space<vmem>>, %arg6: memref<1x32x256xf32, #tpu.memory_space<vmem>>, %arg7: memref<1x32x256xf32, #tpu.memory_space<vmem>>) attributes {dimension_semantics = [#tpu.dimension_semantics<parallel>, #tpu.dimension_semantics<arbitrary>], iteration_bounds = array<i64: 2, 1>, scalar_prefetch = 0 : i64, scratch_operands = 2 : i64, tpu.core_type = #tpu.core_type<tc>, window_params = [{transform_indices = @transform_0, window_bounds = array<i64: 1, 32, 256>}, {pipeline_mode = #tpu.pipeline_mode<synchronous>, transform_indices = @transform_1, window_bounds = array<i64: 32, 2>}, {pipeline_mode = #tpu.pipeline_mode<synchronous>, transform_indices = @transform_2, window_bounds = array<i64: 2, 32>}, {transform_indices = @transform_3, window_bounds = array<i64: 1, 1, 32>}]} {
    %c0_i32 = arith.constant 0 : i32
    %0 = arith.cmpi eq, %arg1, %c0_i32 : i32
    %1 = arith.extui %0 : i1 to i32
    %c0_i32_0 = arith.constant 0 : i32
    %2 = arith.cmpi ne, %1, %c0_i32_0 : i32
    scf.if %2 {
      %cst_18 = arith.constant 0.000000e+00 : f32
      %17 = vector.broadcast %cst_18 : f32 to vector<1x32x256xf32>
      %c0_19 = arith.constant 0 : index
      %c0_20 = arith.constant 0 : index
      %c0_21 = arith.constant 0 : index
      %18 = vector.load %arg6[%c0_19, %c0_20, %c0_21] : memref<1x32x256xf32, #tpu.memory_space<vmem>>, vector<1x32x256xf32>
      tpu.vector_store %arg6[%c0_19, %c0_20, %c0_21], %17 {strides = array<i32>} : memref<1x32x256xf32, #tpu.memory_space<vmem>>, vector<1x32x256xf32>,
      %cst_22 = arith.constant 0xFF800000 : f32
      %19 = vector.broadcast %cst_22 : f32 to vector<1x32x256xf32>
      %c0_23 = arith.constant 0 : index
      %c0_24 = arith.constant 0 : index
      %c0_25 = arith.constant 0 : index
      %20 = vector.load %arg7[%c0_23, %c0_24, %c0_25] : memref<1x32x256xf32, #tpu.memory_space<vmem>>, vector<1x32x256xf32>
      tpu.vector_store %arg7[%c0_23, %c0_24, %c0_25], %19 {strides = array<i32>} : memref<1x32x256xf32, #tpu.memory_space<vmem>>, vector<1x32x256xf32>,
    } else {
    }
    %cst = arith.constant 0.000000e+00 : f32
    %3 = vector.broadcast %cst : f32 to vector<1x32x256xf32>
    %cst_1 = arith.constant 0xFF800000 : f32
    %4 = vector.broadcast %cst_1 : f32 to vector<1x32x256xf32>
    %c0 = arith.constant 0 : index
    %c0_2 = arith.constant 0 : index
    %c0_3 = arith.constant 0 : index
    %5 = vector.load %arg2[%c0, %c0_2, %c0_3] : memref<1x32x256xf32, #tpu.memory_space<vmem>>, vector<1x32x256xf32>
    %6 = arith.addf %3, %5 : vector<1x32x256xf32>
    %7 = arith.maximumf %4, %5 : vector<1x32x256xf32>
    %c0_4 = arith.constant 0 : index
    %c0_5 = arith.constant 0 : index
    %c0_6 = arith.constant 0 : index
    %8 = vector.load %arg6[%c0_4, %c0_5, %c0_6] : memref<1x32x256xf32, #tpu.memory_space<vmem>>, vector<1x32x256xf32>
    %9 = arith.addf %8, %6 : vector<1x32x256xf32>
    %c0_7 = arith.constant 0 : index
    %c0_8 = arith.constant 0 : index
    %c0_9 = arith.constant 0 : index
    %10 = vector.load %arg6[%c0_7, %c0_8, %c0_9] : memref<1x32x256xf32, #tpu.memory_space<vmem>>, vector<1x32x256xf32>
    tpu.vector_store %arg6[%c0_7, %c0_8, %c0_9], %9 {strides = array<i32>} : memref<1x32x256xf32, #tpu.memory_space<vmem>>, vector<1x32x256xf32>,
    %c0_10 = arith.constant 0 : index
    %c0_11 = arith.constant 0 : index
    %c0_12 = arith.constant 0 : index
    %11 = vector.load %arg7[%c0_10, %c0_11, %c0_12] : memref<1x32x256xf32, #tpu.memory_space<vmem>>, vector<1x32x256xf32>
    %12 = arith.maximumf %11, %7 : vector<1x32x256xf32>
    %c0_13 = arith.constant 0 : index
    %c0_14 = arith.constant 0 : index
    %c0_15 = arith.constant 0 : index
    %13 = vector.load %arg7[%c0_13, %c0_14, %c0_15] : memref<1x32x256xf32, #tpu.memory_space<vmem>>, vector<1x32x256xf32>
    tpu.vector_store %arg7[%c0_13, %c0_14, %c0_15], %12 {strides = array<i32>} : memref<1x32x256xf32, #tpu.memory_space<vmem>>, vector<1x32x256xf32>,
    %c0_i32_16 = arith.constant 0 : i32
    %14 = arith.cmpi eq, %arg1, %c0_i32_16 : i32
    %15 = arith.extui %14 : i1 to i32
    %c0_i32_17 = arith.constant 0 : i32
    %16 = arith.cmpi ne, %15, %c0_i32_17 : i32
    scf.if %16 {
      %c0_18 = arith.constant 0 : index
      %c0_19 = arith.constant 0 : index
      %c0_20 = arith.constant 0 : index
      %17 = vector.load %arg6[%c0_18, %c0_19, %c0_20] : memref<1x32x256xf32, #tpu.memory_space<vmem>>, vector<1x32x256xf32>
      %cst_21 = arith.constant dense<0.000000e+00> : vector<1x32xf32>
      %18 = vector.multi_reduction <add>, %17, %cst_21 [2] : vector<1x32x256xf32> to vector<1x32xf32>
      %cst_22 = arith.constant 3.906250e-03 : f32
      %19 = vector.broadcast %cst_22 : f32 to vector<1x32xf32>
      %20 = arith.mulf %18, %19 : vector<1x32xf32>
      %c0_23 = arith.constant 0 : index
      %c0_24 = arith.constant 0 : index
      %c0_25 = arith.constant 0 : index
      %21 = vector.load %arg7[%c0_23, %c0_24, %c0_25] : memref<1x32x256xf32, #tpu.memory_space<vmem>>, vector<1x32x256xf32>
      %cst_26 = arith.constant dense<0xFF800000> : vector<1x32xf32>
      %22 = vector.multi_reduction <maximumf>, %21, %cst_26 [2] : vector<1x32x256xf32> to vector<1x32xf32>
      %23 = tpu.concatenate %20, %22 in 0 : vector<1x32xf32>, vector<1x32xf32> -> vector<2x32xf32>
      %c0_27 = arith.constant 0 : index
      %c0_28 = arith.constant 0 : index
      %24 = vector.load %arg3[%c0_27, %c0_28] : memref<32x2xf32, #tpu.memory_space<vmem>>, vector<32x2xf32>
      %c0_29 = arith.constant 0 : index
      %c0_30 = arith.constant 0 : index
      %25 = vector.load %arg4[%c0_29, %c0_30] : memref<2x32xf32, #tpu.memory_space<vmem>>, vector<2x32xf32>
      %cst_31 = arith.constant dense<0.000000e+00> : vector<2x2xf32>
      %26 = tpu.matmul %23, %24, %cst_31 {dimension_numbers = #tpu.dot_dimension_numbers<[1], [0], [0], [1], [0, 0, 1, 1], [], []>} : vector<2x32xf32>, vector<32x2xf32>, vector<2x2xf32> -> vector<2x2xf32>
      %cst_32 = arith.constant 0.000000e+00 : f32
      %27 = vector.broadcast %cst_32 : f32 to vector<2x2xf32>
      %28 = arith.maximumf %26, %27 : vector<2x2xf32>
      %cst_33 = arith.constant dense<0.000000e+00> : vector<2x32xf32>
      %29 = tpu.matmul %28, %25, %cst_33 {dimension_numbers = #tpu.dot_dimension_numbers<[1], [0], [0], [1], [0, 0, 1, 1], [], []>} : vector<2x2xf32>, vector<2x32xf32>, vector<2x32xf32> -> vector<2x32xf32>
      %30 = vector.extract_strided_slice %29 {offsets = [0, 0], sizes = [1, 32], strides = [1, 1]} : vector<2x32xf32> to vector<1x32xf32>
      %31 = vector.extract_strided_slice %29 {offsets = [1, 0], sizes = [1, 32], strides = [1, 1]} : vector<2x32xf32> to vector<1x32xf32>
      %32 = arith.addf %30, %31 : vector<1x32xf32>
      %33 = arith.negf %32 : vector<1x32xf32>
      %34 = math.exp %33 : vector<1x32xf32>
      %cst_34 = arith.constant 1.000000e+00 : f32
      %35 = vector.broadcast %cst_34 : f32 to vector<1x32xf32>
      %36 = arith.addf %35, %34 : vector<1x32xf32>
      %37 = arith.divf %35, %36 : vector<1x32xf32>
      %38 = vector.shape_cast %37 : vector<1x32xf32> to vector<1x1x32xf32>
      %c0_35 = arith.constant 0 : index
      %c0_36 = arith.constant 0 : index
      %c0_37 = arith.constant 0 : index
      %39 = vector.load %arg5[%c0_35, %c0_36, %c0_37] : memref<1x1x32xf32, #tpu.memory_space<vmem>>, vector<1x1x32xf32>
      tpu.vector_store %arg5[%c0_35, %c0_36, %c0_37], %38 {strides = array<i32>} : memref<1x1x32xf32, #tpu.memory_space<vmem>>, vector<1x1x32xf32>,
    } else {
    }
    return
  }
  func.func @transform_0(%arg0: i32, %arg1: i32) -> (i32, i32, i32) {
    %c0_i32 = arith.constant 0 : i32
    %c0_i32_0 = arith.constant 0 : i32
    return %arg0, %c0_i32, %arg1 : i32, i32, i32
  }
  func.func @transform_1(%arg0: i32, %arg1: i32) -> (i32, i32) {
    %c0_i32 = arith.constant 0 : i32
    %c0_i32_0 = arith.constant 0 : i32
    %c0_i32_1 = arith.constant 0 : i32
    return %c0_i32, %c0_i32_0 : i32, i32
  }
  func.func @transform_2(%arg0: i32, %arg1: i32) -> (i32, i32) {
    %c0_i32 = arith.constant 0 : i32
    %c0_i32_0 = arith.constant 0 : i32
    %c0_i32_1 = arith.constant 0 : i32
    return %c0_i32, %c0_i32_0 : i32, i32
  }
  func.func @transform_3(%arg0: i32, %arg1: i32) -> (i32, i32, i32) {
    %c0_i32 = arith.constant 0 : i32
    %c0_i32_0 = arith.constant 0 : i32
    %c0_i32_1 = arith.constant 0 : i32
    return %arg0, %c0_i32, %c0_i32_0 : i32, i32, i32
  }
}

</mosaic_0001>

<bundles_post_ra>
// kernel: tpu_custom_call.1
= control target key start
LH: loop header
LB: loop body
LE: loop exit
PB: predicated region body
PF: predicated region fallthrough
CT: control target
= control target key end

     0   :  { %8 = vsyncpa [#allocation5], 0  ;;  %s1103_s0 = inlined_call_operand.hbm [shape: f32[2,32,256], index: 0, kind: input, shape index: {}]   ;;  %s1104_s1 = inlined_call_operand.vmem [shape: f32[32,2], index: 1, kind: input, shape index: {}]   ;;  %s1105_s2 = inlined_call_operand.vmem [shape: f32[2,32], index: 2, kind: input, shape index: {}]   ;;  %s1106_s3 = inlined_call_operand.hbm [shape: f32[2,1,32], index: 3, kind: output, shape index: {}]  }
   0x1   :  { %10 = vsyncpa [#allocation5 + $0x1], 0 }
   0x2   :  { %11 = vsyncpa [#allocation6], 0 }
   0x3   :  { %13 = vsyncpa [#allocation6 + $0x1], 0  ;;  %s912_s12 = smov 0   ;;  %s914_s13 = smov 0  }
   0x4   :  { %s916_s14 = smov 0   ;;  %s918_s15 = smov 0  }
   0x5   :  { %s920_s16 = smov 0   ;;  %s922_s17 = smov 0  }
   0x6 LB: > { %s654_s18 = sadd.s32 4294967295, %s883_s17   ;;  %s655_s19 = sadd.s32 4294967294, %s883_s17   ;;  %s883_s17 = sphi %s922_s17, %s19_s17   ;;  %s879_s16 = sphi %s920_s16, %s1121_s16   ;;  %s875_s15 = sphi %s918_s15, %s1120_s15   ;;  %s871_s14 = sphi %s916_s14, %s1119_s14   ;;  %s867_s13 = sphi %s914_s13, %s1118_s13   ;;  %s863_s12 = sphi %s912_s12, %s1117_s12  }
   0x7   : > { %s31_s20 = sadd.s32 1, %s879_s16  ;;  %s40_s21 = sadd.s32 1, %s871_s14 }
   0x8   : > { %p33_p0 = scmp.ge.s32.totalorder %s31_s20, 2  ;;  %p47_p1 = scmp.ne.s32.totalorder %s871_s14, %s867_s13 }
   0x9   : > { %p48_p2 = scmp.eq.s32.totalorder %s883_s17, 0  ;;  %p53_p3 = scmp.ne.s32.totalorder %s867_s13, %s863_s12 }
   0xa   : > { %s1123_s20 = smov (%p33_p0, %s31_s20), 0  ;;  %p54_p5 = scmp.eq.s32.totalorder %s654_s18, 0 }
   0xb   : > { %p953_p4 = por %p48_p2, %p47_p1  ;;  %s35_s23 = ssub.s32 %s879_s16, %s1123_s20 }
   0xc   : > { %p119_p6 = scmp.eq.s32.totalorder %s654_s18, 1  ;;  %p38_p7 = scmp.eq.s32.totalorder %s35_s23, 0 }
   0xd   : > { %p959_p8 = por %p54_p5, %p53_p3  ;;  %p125_p10 = scmp.eq.s32.totalorder %s655_s19, 1 }
   0xe   : > { %p963_p9 = por %p119_p6, %p47_p1  ;;  %p712_p13 = scmp.lt.s32.totalorder %s883_s17, 2 }
   0xf   : > { %s968_s26 = scalar_select %p38_p7, %s871_s14, %s40_s21  }
  0x10   : > { %s1110_s25 = scalar_select %p963_p9, 1, 0 }
  0x11   : > { %p970_p11 = por %p125_p10, %p53_p3  ;;  %s151_s28 = sand.u32 1, %s871_s14  }
  0x12   : > { %s658_s29 = sshll.u32 %s151_s28, 6  ;;  %s670_s30 = sshll.u32 %s879_s16, 10 }
  0x13   : > { %s1111_s27 = scalar_select %p970_p11, 1, 0 }
  0x14   : > { %s981_s6 = scalar_lea.hbm %s1103_s0, %s670_s30  ;;  %s155_s7 = scalar_lea.vmem [#allocation4], %s658_s29 }
  0x15   : > { %s164_s8 = sshll.u32 %s155_s7, 4  ;;  %p987_p0 = pnand %p712_p13, %p953_p4  ;;  %s983_s8 = int_to_ptr.vmem [resolvable:$true] %s164_s8 }
  0x16   : > { %s992_s10 = scalar_lea.sflag [#allocation5], %s151_s28  ;;  %s771_s11 = scalar_lea.hbm %s981_s6, 1024 }
  0x17   : > { %p772_p2 = scmp.ne.s32.totalorder %s981_s6, %s771_s11  ;;  %p773_p3 = pneg %p987_p0 }
  0x18   : > { %s776_s21 = scalar_lea.hbm %s1103_s0, 2048  ;;  %p777_p4 = scmp.lt.u32.totalorder %s981_s6, %s1103_s0 }
  0x19   : > { %p774_p5 = pnand %p773_p3, %p772_p2  ;;  %p778_p7 = scmp.lt.u32.totalorder %s776_s21, %s771_s11 }
  0x1a   : > { %p780_p13 = scmp.lt.u32.totalorder %s771_s11, %s981_s6 }
  0x1b   : > { %p775_p6 = pneg %p774_p5  ;;  %p779_p10 = por %p778_p7, %p777_p4 }
  0x1d   : > { %p781_p12 = por %p780_p13, %p779_p10 }
  0x1f   : > { %p782_p1 = pnand %p781_p12, %p775_p6 }
  0x21   : > { %785 = shalt.err (!%p782_p1)
}
  0x22   : > { %s786_s28 = scalar_lea.vmem %s983_s8, 1024  ;;  %s885_s29 = smov [#allocation4]  }
  0x23   : > { %p787_p2 = scmp.ne.s32.totalorder %s983_s8, %s786_s28  ;;  %s791_s30 = sshll.u32 %s885_s29, 4  ;;  %s792_s30 = int_to_ptr.vmem [resolvable:$false] %s791_s30 }
  0x24   : > { %s793_s4 = scalar_lea.vmem %s792_s30, 2048  ;;  %p794_p9 = scmp.lt.s32.totalorder %s983_s8, %s792_s30 }
  0x25   : > { %p789_p5 = pnand %p787_p2, %p773_p3  ;;  %p795_p4 = scmp.lt.s32.totalorder %s793_s4, %s786_s28 }
  0x27   : > { %p790_p11 = pneg %p789_p5  ;;  %p796_p7 = por %p795_p4, %p794_p9 }
  0x29   : > { %p797_p10 = pnand %p796_p7, %p790_p11 }
  0x2b   : > { %800 = shalt.err (!%p797_p10)
}
  0x2c   : > { %s886_s5 = smov 256   ;;  %s887_s7 = smov 16  }
  0x2d   : > { %707 = dma.hbm_to_vmem [thread:$0]  (!%p987_p0), %s981_s6, 1024, %s983_s8, %s992_s10, %s886_s5, %s886_s5, %s887_s7  }
  0x2e   : > { %p172_p12 = scmp.lt.s32.totalorder %s883_s17, 3  ;;  %p1113_p1 = scmp.ge.s32.totalorder %s883_s17, 1 }
  0x30   : > { %p173_p3 = pnand %p1113_p1, %p172_p12 }
  0x31   : > { %s1024_s11 = sand.u32 (!%p173_p3), 1, %s867_s13  }
  0x32   : > { %176 = sbr.rel (%p173_p3) target bundleno = 691 (0x2b3), region = 32  ;;  %s662_s18 = sshll.u32 (!%p173_p3), %s1024_s11, 6 }
  0x33   : > { %s179_s19 = scalar_lea.sflag (!%p173_p3), [#allocation5], %s1024_s11  ;;  %s182_s21 = scalar_lea.vmem (!%p173_p3), [#allocation4], %s662_s18 }
  0x39   : > { %854 = dma.done.wait (%p959_p8), %s179_s19, 1024  }
  0x3a   : > { %856 = vsyncadd (%p959_p8), %s179_s19, 4294966272  ;;  %v229_v0 = vld [vmem:[%s182_s21 + $0x20] sm:$0xff]  ;;  %v230_v1 = vld [vmem:[%s182_s21 + $0x28] sm:$0xff]  ;;  %v888_v19 = vmov 0.0|0.0   ;;  %vm889_vm0 = vmmov 0   ;;  %v890_v23 = vmov 0.0   ;;  %v340_v24 = vlaneseq }
  0x3b   : > { %v225_v2 = vld [vmem:[%s182_s21] sm:$0xff]  ;;  %v306_v3 = vadd.f32 %v230_v1, %v229_v0  ;;  %v226_v4 = vld [vmem:[%s182_s21 + $0x8] sm:$0xff]  ;;  %v231_v5 = vld [vmem:[%s182_s21 + $0x30] sm:$0xff]  ;;  %v330_v15 = vmax.f32 %v229_v0, %v230_v1  ;;  %694 = vmatprep.subr.bf16.mxu0 %v888_v19  ;;  %686 = vmatprep.mubr.msk.f32.mxu0 %vm889_vm0, %v890_v23  ;;  %vm351_vm1 = vcmask 130112   ;;  %vm358_vm2 = vcmask 195712   ;;  %s667_s4 = sshll.u32 %s875_s15, 4 }
  0x3c   : > { %v232_v6 = vld [vmem:[%s182_s21 + $0x38] sm:$0xff]  ;;  %v300_v7 = vadd.f32 %v226_v4, %v225_v2  ;;  %v227_v8 = vld [vmem:[%s182_s21 + $0x10] sm:$0xff]  ;;  %v324_v13 = vmax.f32 %v225_v2, %v226_v4  ;;  %v394_v16 = vld [vmem:[%s1104_s1] sm:$0xff]  ;;  %689 = vmatprep.subr.mxu1 %v890_v23  ;;  %691 = vmatprep.mubr.msk.f32.mxu1 %vm889_vm0, %v890_v23  ;;  %v341_v25 = vand.u32 127, %v340_v24  ;;  %v343_v28 = vshrl.u32 %v340_v24, 7  ;;  %s203_s5 = scalar_lea.vmem [#allocation7], %s1024_s11 }
  0x3d   : > { %v228_v9 = vld [vmem:[%s182_s21 + $0x18] sm:$0xff]  ;;  %307 = vadd.xlane.f32.xlu1 %v306_v3  ;;  %v309_v10 = vadd.f32 %v232_v6, %v231_v5  ;;  %v333_v14 = vmax.f32 %v231_v5, %v232_v6  ;;  %v395_v17 = vld [vmem:[%s1104_s1 + $0x8] sm:$0xff]  ;;  %v396_v20 = vld [vmem:[%s1104_s1 + $0x10] sm:$0xff]  ;;  %vm365_vm3 = vcmask 261312   ;;  %vm392_vm4 = vcmask 1040384   ;;  %s577_s7 = sshll.u32 %s203_s5, 4  ;;  %s1054_s21 = scalar_lea.hbm %s1106_s3, %s667_s4  ;;  %s1056_s7 = int_to_ptr.vmem [resolvable:$true] %s577_s7 }
  0x3e   : > { %301 = vadd.xlane.f32.xlu0 %v300_v7  ;;  %v303_v11 = vadd.f32 %v228_v9, %v227_v8  ;;  %v327_v12 = vmax.f32 %v227_v8, %v228_v9  ;;  %v695_v18 = vpack.c.bf16 %v395_v17, %v394_v16  ;;  %v397_v21 = vld [vmem:[%s1104_s1 + $0x18] sm:$0xff]  ;;  %v346_v27 = vadd.s32 4294967288, %v341_v25  ;;  %v398_v61 = vld [vmem:[%s1105_s2] sm:$0x3]  ;;  %s565_s24 = scalar_lea.sflag [#allocation6], %s1024_s11  ;;  %s801_s6 = scalar_lea.vmem %s1056_s7, 16 }
  0x3f   : > { %v698_v22 = vpack.c.bf16 %v397_v21, %v396_v20  ;;  %v353_v30 = vadd.s32 4294967280, %v341_v25  ;;  %v344_v33 = vsub.s32 %v341_v25, %v343_v28  ;;  %v360_v35 = vadd.s32 4294967272, %v341_v25  ;;  %p802_p8 = scmp.ne.s32.totalorder %s1056_s7, %s801_s6  ;;  %p1114_p9 = scmp.ne.s32.totalorder %s1110_s25, 0 }
  0x40   : > { %696 = vmatpush3.bf16.msra.mxu0 %v695_v18  ;;  %v349_v32 = vsub.s32 %v346_v27, %v343_v28  ;;  %vm399_vm5 = vcmask 261120   ;;  %vm478_vm6 = vcmask 1041408   ;;  %vm474_vm7 = vcmask 15360   ;;  %s891_s15 = smov [#allocation7]  }
  0x41   : > { %310 = vadd.xlane.f32.xlu1 %v309_v10  ;;  %697 = vmatprep.subr.bf16.mxu0 %v888_v19  ;;  %v356_v38 = vsub.s32 %v353_v30, %v343_v28  ;;  %v363_v43 = vsub.s32 %v360_v35, %v343_v28  ;;  %vm562_vm8 = vcmask 253952   ;;  %p803_p11 = pnand %p802_p8, %p1114_p9  ;;  %s805_s8 = sshll.u32 %s891_s15, 4  ;;  %s806_s8 = int_to_ptr.vmem [resolvable:$false] %s805_s8 }
  0x42   : > { %304 = vadd.xlane.f32.xlu0 %v303_v11  ;;  %690 = vmatpush3.msk.msra.mxu1 %vm478_vm6, %v398_v61  ;;  %s807_s9 = scalar_lea.vmem %s806_s8, 32  ;;  %p808_p6 = scmp.lt.s32.totalorder %s1056_s7, %s806_s8 }
  0x43   : > { %p804_p0 = pneg %p803_p11  ;;  %p809_p13 = scmp.lt.s32.totalorder %s807_s9, %s801_s6 }
  0x44   : > { %699 = vmatpush3.bf16.msra.mxu0 %v698_v22 }
  0x45   : > { %328 = vmax.xlane.f32.xlu1 %v327_v12  ;;  %p810_p2 = por %p809_p13, %p808_p6 }
  0x46   : > { %325 = vmax.xlane.f32.xlu0 %v324_v13 }
  0x47   : > { %p811_p5 = pnand %p810_p2, %p804_p0 }
  0x49   : > { %334 = vmax.xlane.f32.xlu1 %v333_v14 }
  0x4a   : > { %331 = vmax.xlane.f32.xlu0 %v330_v15 }
  0xca   : > { %v308_v26 = vpop.xlane.xlu1 %307 }
  0xcb   : > { %v302_v29 = vpop.xlane.xlu0 %301  ;;  %v314_v39 = vmul.f32 0.00390625, %v308_v26 }
  0xcc   : > { %v312_v34 = vmul.f32 0.00390625, %v302_v29 }
  0xcd   : > { %v357_v49 = vrot.slane %v314_v39, %v356_v38 }
  0xce   : > { %v311_v31 = vpop.xlane.xlu1 %310  ;;  %v345_v42 = vrot.slane %v312_v34, %v344_v33 }
  0xcf   : > { %v305_v36 = vpop.xlane.xlu0 %304  ;;  %v315_v44 = vmul.f32 0.00390625, %v311_v31 }
  0xd0   : > { %v313_v37 = vmul.f32 0.00390625, %v305_v36 }
  0xd1   : > { %v364_v51 = vrot.slane %v315_v44, %v363_v43 }
  0xd2   : > { %v350_v40 = vrot.slane %v313_v37, %v349_v32  ;;  %v329_v41 = vpop.xlane.xlu1 %328 }
  0xd3   : > { %v326_v45 = vpop.xlane.xlu0 %325  ;;  %v379_v47 = vrot.slane %v329_v41, %v349_v32 }
  0xd4   : > { %v352_v46 = vsel %vm351_vm1, %v350_v40, %v345_v42  ;;  %v375_v48 = vrot.slane %v326_v45, %v344_v33 }
  0xd5   : > { %v359_v55 = vsel %vm358_vm2, %v357_v49, %v352_v46 }
  0xd6   : > { %v335_v50 = vpop.xlane.xlu1 %334  ;;  %v380_v56 = vsel %vm351_vm1, %v379_v47, %v375_v48  ;;  %v366_v59 = vsel %vm365_vm3, %v364_v51, %v359_v55 }
  0xd7   : > { %v332_v52 = vpop.xlane.xlu0 %331  ;;  %v389_v53 = vrot.slane %v335_v50, %v363_v43 }
  0xd8   : > { %v384_v54 = vrot.slane %v332_v52, %v356_v38 }
  0xda   : > { %v385_v57 = vsel %vm358_vm2, %v384_v54, %v380_v56 }
  0xdb   : > { %v390_v58 = vsel %vm365_vm3, %v389_v53, %v385_v57 }
  0xdc   : > { %v393_v60 = vsel %vm392_vm4, %v366_v59, %v390_v58 }
  0xdd   : > { %687 = vmatmul.mubr.msk.f32.vlgmr.msra.gmra.mrb[0].mxu0 %vm399_vm5, %v393_v60 }
 0x1b0   : > { %v469_v62 = vpop.f32.mrb[0].mxu0 }
 0x1b1   : > { %v473_v63 = vmax.f32 %v469_v62, 0.0  ;;  %v688_v0 = vpop.f32.mrb[1].mxu0 }
 0x1b3   : > { %692 = vmatmul.mubr.msk.f32.vlgmr.msra.gmra.mrb[0].mxu1 %vm474_vm7, %v473_v63 }
 0x286   : > { %v548_v1 = vpop.f32.mrb[0].mxu1 }
 0x287   : > { %v553_v2 = vrot.slane %v548_v1, 1  ;;  %v693_v3 = vpop.f32.mrb[1].mxu1 }
 0x289   : > { %v555_v4 = vadd.f32 %v553_v2, %v548_v1 }
 0x28b   : > { %v666_v5 = vmul.f32 -1.442695, %v555_v4 }
 0x28d   : > { %767 = vpow2.f32 %v666_v5 }
 0x297   : > { %v768_v6 = vpop.eup %767 }
 0x298   : > { %v559_v7 = vadd.f32 1.0, %v768_v6 }
 0x29a   : > { %769 = vrcp.f32 %v559_v7 }
 0x2a4   : > { %v770_v8 = vpop.eup %769 }
 0x2a5   : > { %563 = vst.msk [vmem:[%s203_s5] sm:$0x1] %vm562_vm8, %v770_v8 }
 0x2a6   : > { %814 = shalt.err (!%p811_p5)
}
 0x2a7   : > { %s815_s11 = scalar_lea.hbm %s1054_s21, 16  ;;  %s819_s23 = scalar_lea.hbm %s1106_s3, 32 }
 0x2a8   : > { %p816_p4 = scmp.ne.s32.totalorder %s1054_s21, %s815_s11  ;;  %p820_p12 = scmp.lt.u32.totalorder %s1054_s21, %s1106_s3 }
 0x2a9   : > { %p821_p1 = scmp.lt.u32.totalorder %s819_s23, %s815_s11  ;;  %p823_p8 = scmp.lt.u32.totalorder %s815_s11, %s1054_s21 }
 0x2aa   : > { %p817_p7 = pnand %p816_p4, %p1114_p9 }
 0x2ab   : > { %p822_p3 = por %p821_p1, %p820_p12 }
 0x2ac   : > { %p818_p10 = pneg %p817_p7 }
 0x2ad   : > { %p824_p11 = por %p823_p8, %p822_p3 }
 0x2af   : > { %p825_p0 = pnand %p824_p11, %p818_p10 }
 0x2b1   : > { %828 = shalt.err (!%p825_p0)
}
 0x2b2   : > { %702 = dma.vmem_to_hbm [thread:$0]  (%p1114_p9), %s1056_s7, 16, %s1054_s21, %s565_s24  }
 0x2b3 PF: > { %s589_s30 = sand.u32 1, %s863_s12   ;;  %p1115_p6 = scmp.ne.s32.totalorder %s1111_s27, 0 }
 0x2b4   : > { %p1116_p13 = scmp.ge.s32.totalorder %s883_s17, 2  ;;  %s590_s4 = scalar_lea.sflag [#allocation6], %s589_s30 }
 0x2b6   : > { %p709_p2 = pnand %p1116_p13, %p1115_p6 }
 0x2b8   : > { %858 = dma.done.wait (!%p709_p2), %s590_s4, 16  }
 0x2b9   : > { %860 = vsyncadd (!%p709_p2), %s590_s4, 4294967280  ;;  %s19_s17 = sadd.s32 1, %s883_s17   ;;  %s1117_s12 = smov %s867_s13 }
 0x2ba   : > { %p16_p5 = scmp.ge.s32.totalorder %s19_s17, 4   ;;  %s1118_s13 = smov %s871_s14 }
 0x2bb   : > { %s1119_s14 = smov %s968_s26  ;;  %s1120_s15 = smov %s879_s16 }
 0x2bc   : > { %s1121_s16 = smov %s1123_s20  ;;  %18 = sbr.rel (!%p16_p5) target bundleno = 6 (0x6), region = 85 }
 0x2c3   :  { %594 = vsyncpa [#allocation5], 1 }
 0x2c4   :  { %596 = vsyncpa [#allocation5 + $0x1], 1 }
 0x2c5   :  { %597 = vsyncpa [#allocation6], 1 }
 0x2c6   :  { %599 = vsyncpa [#allocation6 + $0x1], 1 }

</bundles_post_ra>
